<compile_context>
chip_gen: v7x
topology: tpu7x:2x2x1
jax: 0.10.0
libtpu: 0.0.40
codegen_flags: <defaults>
</compile_context>

<pallas_src>
import jax
import jax.numpy as jnp
from jax.experimental import pallas as pl
from jax.experimental.pallas import tpu as pltpu


def _copy_kernel(k_ref, o_ref):
    # Single whole-tile assignment (keep the in-VMEM copy off the critical
    # path on v5e's single vector-store slot).
    o_ref[...] = k_ref[...]


def isac_tight_materialize(kernels_2d: jax.Array, tile_c: int | None = None) -> jax.Array:
    """Materialize a copy of the (C, K) kernels slab with a Pallas copy kernel.

    Small slabs: grid-less pallas_call, whole array resident in VMEM.
    Large slabs: tiled over C with ~2 MiB blocks, 'parallel' grid axis.
    """
    C, K = kernels_2d.shape
    itemsize = jnp.dtype(kernels_2d.dtype).itemsize

    if tile_c is None:
        # Target ~2 MiB per block (double-buffered in+out => ~8 MiB resident,
        # comfortably under v7x's 32 MiB scoped-VMEM default).
        target_bytes = 2 << 20
        tile_c = max(8, (target_bytes // max(1, K * itemsize)) // 8 * 8)

    if C <= tile_c:
        # Whole slab in one shot — no grid-loop scaffolding, no prefetch plumbing.
        return pl.pallas_call(
            _copy_kernel,
            out_shape=jax.ShapeDtypeStruct((C, K), kernels_2d.dtype),
            in_specs=[pl.BlockSpec(memory_space=pltpu.MemorySpace.VMEM)],
            out_specs=pl.BlockSpec(memory_space=pltpu.MemorySpace.VMEM),
        )(kernels_2d)

    # Tiled copy over C: K stays full-extent on the lane axis (lane-dense
    # stores), tile_c is a multiple of 8 (sublane tiling constraint).
    grid = (pl.cdiv(C, tile_c),)
    return pl.pallas_call(
        _copy_kernel,
        out_shape=jax.ShapeDtypeStruct((C, K), kernels_2d.dtype),
        grid_spec=pl.GridSpec(
            grid=grid,
            in_specs=[pl.BlockSpec((tile_c, K), lambda i: (i, 0))],
            out_specs=pl.BlockSpec((tile_c, K), lambda i: (i, 0)),
        ),
        compiler_params=pltpu.CompilerParams(
            dimension_semantics=("parallel",),
        ),
    )(kernels_2d)


class ISACTightJax:
    """JAX/Pallas port of hybra._fit_dual.ISACTight."""

    def __init__(self, kernels: jax.Array, d: int, Ls: int):
        self.stride = d
        self.kernel_size = kernels.shape[-1]
        self.Ls = Ls
        self.kernels = kernels  # parameter, shape (C, 1, K) like the PyTorch module

    def forward(self) -> jax.Array:
        # Identity forward: return the parameter itself (zero cost, same
        # aliasing semantics as returning the nn.Parameter in PyTorch).
        return self.kernels

    def materialize(self, tile_c: int | None = None) -> jax.Array:
        """Explicitly materialized copy of the parameter via the Pallas kernel."""
        C, _, K = self.kernels.shape
        out_2d = isac_tight_materialize(self.kernels.reshape(C, K), tile_c=tile_c)
        return out_2d.reshape(C, 1, K)

    __call__ = forward


if __name__ == "__main__":
    # Deterministic synthetic parameter: a small ISAC-style filterbank
    # (num_filters=16, in_channels=1, kernel_size=128), stride d=8, Ls=256.
    key = jax.random.PRNGKey(0)
    num_filters, kernel_size = 16, 128
    d, Ls = 8, 256
    kernels = jax.random.normal(key, (num_filters, 1, kernel_size), dtype=jnp.float32)

    module = ISACTightJax(kernels, d=d, Ls=Ls)

    # Forward semantics: returns the parameter itself.
    out = module()
    assert out is module.kernels
    assert out.shape == kernels.shape and out.dtype == kernels.dtype

    # Pallas copy kernel — grid-less whole-slab path.
    copy_whole = jax.block_until_ready(module.materialize())
    assert copy_whole.shape == kernels.shape
    assert copy_whole.dtype == kernels.dtype
    assert bool(jnp.all(copy_whole == kernels))

    # Pallas copy kernel — tiled-over-C path (force small tile to exercise the grid).
    copy_tiled = jax.block_until_ready(module.materialize(tile_c=8))
    assert bool(jnp.all(copy_tiled == kernels))

    print("KERNEL_OK")
</pallas_src>

<mosaic_0001>
module attributes {stable_mosaic.version = 11 : i64} {
  func.func @_copy_kernel(%arg0: memref<16x128xf32, #tpu.memory_space<vmem>>, %arg1: memref<16x128xf32, #tpu.memory_space<vmem>>) attributes {dimension_semantics = [], scalar_prefetch = 0 : i64, scratch_operands = 0 : i64, tpu.core_type = #tpu.core_type<tc>} {
    %c0 = arith.constant 0 : index
    %c0_0 = arith.constant 0 : index
    %0 = vector.load %arg0[%c0, %c0_0] : memref<16x128xf32, #tpu.memory_space<vmem>>, vector<16x128xf32>
    %c0_1 = arith.constant 0 : index
    %c0_2 = arith.constant 0 : index
    %1 = vector.load %arg1[%c0_1, %c0_2] : memref<16x128xf32, #tpu.memory_space<vmem>>, vector<16x128xf32>
    tpu.vector_store %arg1[%c0_1, %c0_2], %0 {strides = array<i32>} : memref<16x128xf32, #tpu.memory_space<vmem>>, vector<16x128xf32>,
    return
  }
}

</mosaic_0001>

<bundles_post_ra>
// kernel: tpu_custom_call.1
= control target key start
LH: loop header
LB: loop body
LE: loop exit
PB: predicated region body
PF: predicated region fallthrough
CT: control target
= control target key end

     0   :  { %6 = vsyncpa [#allocation3], 0  ;;  %s134_s0 = inlined_call_operand.hbm [shape: f32[16,128], index: 0, kind: input, shape index: {}]   ;;  %s135_s1 = inlined_call_operand.hbm [shape: f32[16,128], index: 1, kind: output, shape index: {}]  }
   0x1   :  { %7 = vsyncpa [#allocation4], 0  ;;  %s96_s6 = smov [#allocation2]   ;;  %s48_s10 = scalar_lea.hbm %s134_s0, 256 }
   0x2   :  { %s13_s7 = sshll.u32 %s96_s6, 4  ;;  %p49_p0 = scmp.ne.s32.totalorder %s134_s0, %s48_s10  ;;  %s14_s7 = int_to_ptr.vmem [resolvable:$true] %s13_s7 }
   0x3   :  { %p52_p1 = scmp.lt.u32.totalorder %s48_s10, %s134_s0 }
   0x5   :  { %p54_p2 = pnand %p52_p1, %p49_p0 }
   0x7   :  { %57 = shalt.err (!%p54_p2)
}
   0x8   :  { %s58_s15 = scalar_lea.vmem %s14_s7, 256  ;;  %p63_p4 = scmp.lt.s32.totalorder %s14_s7, %s14_s7 }
   0x9   :  { %p59_p3 = scmp.ne.s32.totalorder %s14_s7, %s58_s15  ;;  %p64_p5 = scmp.lt.s32.totalorder %s58_s15, %s58_s15 }
   0xb   :  { %p65_p6 = por %p64_p5, %p63_p4 }
   0xd   :  { %p66_p7 = pnand %p65_p6, %p59_p3 }
   0xf   :  { %69 = shalt.err (!%p66_p7)
}
  0x10   :  { %s97_s16 = smov 128   ;;  %s98_s17 = smov 8  }
  0x11   :  { %19 = dma.hbm_to_vmem [thread:$0]  %s134_s0, 256, %s14_s7, [#allocation3], %s97_s16, %s97_s16, %s98_s17  }
  0x12   :  { %92 = dma.done.wait [#allocation3], 256  }
  0x13   :  { %93 = vsyncadd [#allocation3], 4294967040  ;;  %s99_s20 = smov [#allocation5]   ;;  %v23_v0 = vld [vmem:[#allocation2] sm:$0xff]  ;;  %v24_v1 = vld [vmem:[#allocation2 + $0x8] sm:$0xff] }
  0x14   :  { %s32_s21 = sshll.u32 %s99_s20, 4  ;;  %25 = vst [vmem:[#allocation5] sm:$0xff] %v23_v0  ;;  %26 = vst [vmem:[#allocation5 + $0x8] sm:$0xff] %v24_v1  ;;  %s33_s21 = int_to_ptr.vmem [resolvable:$true] %s32_s21 }
  0x15   :  { %s70_s22 = scalar_lea.vmem %s33_s21, 256  ;;  %p75_p9 = scmp.lt.s32.totalorder %s33_s21, %s33_s21 }
  0x16   :  { %p71_p8 = scmp.ne.s32.totalorder %s33_s21, %s70_s22  ;;  %p76_p10 = scmp.lt.s32.totalorder %s70_s22, %s70_s22 }
  0x18   :  { %p77_p11 = por %p76_p10, %p75_p9 }
  0x1a   :  { %p78_p12 = pnand %p77_p11, %p71_p8 }
  0x1c   :  { %81 = shalt.err (!%p78_p12)
}
  0x1d   :  { %s82_s0 = scalar_lea.hbm %s135_s1, 256 }
  0x1e   :  { %p83_p13 = scmp.ne.s32.totalorder %s135_s1, %s82_s0  ;;  %p86_p0 = scmp.lt.u32.totalorder %s82_s0, %s135_s1 }
  0x20   :  { %p88_p1 = pnand %p86_p0, %p83_p13 }
  0x22   :  { %91 = shalt.err (!%p88_p1)
}
  0x23   :  { %38 = dma.vmem_to_hbm [thread:$0]  %s33_s21, 256, %s135_s1, [#allocation4], %s97_s16, %s97_s16, %s98_s17  }
  0x24   :  { %94 = dma.done.wait [#allocation4], 256  }
  0x25   :  { %95 = vsyncadd [#allocation4], 4294967040 }
  0x26   :  { %42 = vsyncpa [#allocation3], 1 }
  0x27   :  { %43 = vsyncpa [#allocation4], 1 }

</bundles_post_ra>
